<compile_context>
chip_gen: v5e
topology: v5e:2x2
jax: 0.10.0
libtpu: 0.0.40
codegen_flags: <defaults>
</compile_context>

<pallas_src>
import jax
import jax.numpy as jnp
from jax.experimental import pallas as pl
from jax.experimental.pallas import tpu as pltpu


def mlp_kernel(xT_ref, w1_ref, b1_ref, w2_ref, b2_ref, o_ref):
    # xT:       (1, Npad)   batch mapped to lanes
    # w1,b1,w2: (H, 1)      per-hidden-unit columns (broadcast along lanes)
    # b2:       (1, 1)
    # Layer 1 (F == 1): rank-1 outer product -> pure VPU broadcast multiply.
    h = w1_ref[...] * xT_ref[...] + b1_ref[...]            # (H, Npad)
    h = jnp.maximum(h, 0.0)                                # ReLU on VPU
    # Layer 2 (O == 1): weighted reduce over the H sublanes (XLU), no MXU.
    out = jnp.sum(h * w2_ref[...], axis=0, keepdims=True)  # (1, Npad)
    o_ref[...] = (out + b2_ref[...]).astype(o_ref.dtype)


def net_forward(x, w1, b1, w2, b2):
    """PyTorch-Linear-equivalent forward pass.

    x:  (N, 1) f32                    (n_feature == 1)
    w1: (1, H), b1: (1, H)            hidden layer, stored (in, out)
    w2: (H, 1), b2: (1, 1)            predict layer, stored (in, out)
    returns (N, 1) f32  ==  relu(x @ w1 + b1) @ w2 + b2
    """
    n, f = x.shape
    h_dim = w1.shape[1]
    o_dim = w2.shape[1]
    assert f == 1 and o_dim == 1, "kernel specialized for n_feature=1, n_output=1"

    # Lane-dense, padded layout: batch -> lanes, N padded up to a multiple of 128.
    n_pad = ((n + 127) // 128) * 128
    xT = jnp.zeros((1, n_pad), jnp.float32).at[0, :n].set(x[:, 0])
    w1c = w1.reshape(h_dim, 1).astype(jnp.float32)   # (H, 1)
    b1c = b1.reshape(h_dim, 1).astype(jnp.float32)   # (H, 1)
    w2c = w2.reshape(h_dim, 1).astype(jnp.float32)   # (H, 1)
    b2c = b2.reshape(1, 1).astype(jnp.float32)       # (1, 1)

    vmem = pl.BlockSpec(memory_space=pltpu.MemorySpace.VMEM)
    out_T = pl.pallas_call(
        mlp_kernel,
        out_shape=jax.ShapeDtypeStruct((1, n_pad), jnp.float32),
        in_specs=[vmem, vmem, vmem, vmem, vmem],
        out_specs=vmem,
    )(xT, w1c, b1c, w2c, b2c)

    # Strip lane padding (padded lanes carry garbage from relu(b1)) and
    # restore the (N, 1) layout of the PyTorch module.
    return out_T[0, :n].reshape(n, 1)


if __name__ == "__main__":
    # Shapes implied by the PyTorch script: x = linspace(-1, 1, 100)[:, None]
    # -> n_feature = 1; small hidden = 32; n_output = 1.
    N, F, H, O = 100, 1, 32, 1

    key = jax.random.PRNGKey(0)
    k1, k2, k3, k4 = jax.random.split(key, 4)

    # Deterministic init mimicking torch.nn.Linear's U(-1/sqrt(fan_in), +1/sqrt(fan_in)).
    bound1 = 1.0 / jnp.sqrt(jnp.array(F, jnp.float32))
    bound2 = 1.0 / jnp.sqrt(jnp.array(H, jnp.float32))
    w1 = jax.random.uniform(k1, (F, H), jnp.float32, -bound1, bound1)
    b1 = jax.random.uniform(k2, (1, H), jnp.float32, -bound1, bound1)
    w2 = jax.random.uniform(k3, (H, O), jnp.float32, -bound2, bound2)
    b2 = jax.random.uniform(k4, (1, O), jnp.float32, -bound2, bound2)

    # Input matching the PyTorch script: x = linspace(-1, 1, 100)[:, None]
    x = jnp.linspace(-1.0, 1.0, N, dtype=jnp.float32).reshape(N, F)

    y = jax.block_until_ready(net_forward(x, w1, b1, w2, b2))

    # Pure-JAX reference check (PyTorch Linear semantics with W stored (in, out)).
    y_ref = jnp.maximum(x @ w1 + b1, 0.0) @ w2 + b2
    assert y.shape == (N, O)
    assert jnp.allclose(y, y_ref, atol=1e-5, rtol=1e-5)

    print("KERNEL_OK")
</pallas_src>

<mosaic_0001>
module attributes {stable_mosaic.version = 11 : i64} {
  func.func @mlp_kernel(%arg0: memref<1x128xf32, #tpu.memory_space<vmem>>, %arg1: memref<32x1xf32, #tpu.memory_space<vmem>>, %arg2: memref<32x1xf32, #tpu.memory_space<vmem>>, %arg3: memref<32x1xf32, #tpu.memory_space<vmem>>, %arg4: memref<1x1xf32, #tpu.memory_space<vmem>>, %arg5: memref<1x128xf32, #tpu.memory_space<vmem>>) attributes {dimension_semantics = [], scalar_prefetch = 0 : i64, scratch_operands = 0 : i64, tpu.core_type = #tpu.core_type<tc>} {
    %c0 = arith.constant 0 : index
    %c0_0 = arith.constant 0 : index
    %0 = vector.load %arg1[%c0, %c0_0] : memref<32x1xf32, #tpu.memory_space<vmem>>, vector<32x1xf32>
    %c0_1 = arith.constant 0 : index
    %c0_2 = arith.constant 0 : index
    %1 = vector.load %arg0[%c0_1, %c0_2] : memref<1x128xf32, #tpu.memory_space<vmem>>, vector<1x128xf32>
    %2 = vector.broadcast %0 : vector<32x1xf32> to vector<32x128xf32>
    %3 = vector.broadcast %1 : vector<1x128xf32> to vector<32x128xf32>
    %4 = arith.mulf %2, %3 : vector<32x128xf32>
    %c0_3 = arith.constant 0 : index
    %c0_4 = arith.constant 0 : index
    %5 = vector.load %arg2[%c0_3, %c0_4] : memref<32x1xf32, #tpu.memory_space<vmem>>, vector<32x1xf32>
    %6 = vector.broadcast %5 : vector<32x1xf32> to vector<32x128xf32>
    %7 = arith.addf %4, %6 : vector<32x128xf32>
    %cst = arith.constant 0.000000e+00 : f32
    %8 = vector.broadcast %cst : f32 to vector<32x128xf32>
    %9 = arith.maximumf %7, %8 : vector<32x128xf32>
    %c0_5 = arith.constant 0 : index
    %c0_6 = arith.constant 0 : index
    %10 = vector.load %arg3[%c0_5, %c0_6] : memref<32x1xf32, #tpu.memory_space<vmem>>, vector<32x1xf32>
    %11 = vector.broadcast %10 : vector<32x1xf32> to vector<32x128xf32>
    %12 = arith.mulf %9, %11 : vector<32x128xf32>
    %cst_7 = arith.constant dense<0.000000e+00> : vector<128xf32>
    %13 = vector.multi_reduction <add>, %12, %cst_7 [0] : vector<32x128xf32> to vector<128xf32>
    %14 = vector.shape_cast %13 : vector<128xf32> to vector<1x128xf32>
    %c0_8 = arith.constant 0 : index
    %c0_9 = arith.constant 0 : index
    %15 = vector.load %arg4[%c0_8, %c0_9] : memref<1x1xf32, #tpu.memory_space<vmem>>, vector<1x1xf32>
    %16 = vector.broadcast %15 : vector<1x1xf32> to vector<1x128xf32>
    %17 = arith.addf %14, %16 : vector<1x128xf32>
    %c0_10 = arith.constant 0 : index
    %c0_11 = arith.constant 0 : index
    %18 = vector.load %arg5[%c0_10, %c0_11] : memref<1x128xf32, #tpu.memory_space<vmem>>, vector<1x128xf32>
    tpu.vector_store %arg5[%c0_10, %c0_11], %17 {strides = array<i32>} : memref<1x128xf32, #tpu.memory_space<vmem>>, vector<1x128xf32>,
    return
  }
}

</mosaic_0001>

<bundles_post_ra>
// kernel: tpu_custom_call.1
= control target key start
LH: loop header
LB: loop body
LE: loop exit
PB: predicated region body
PF: predicated region fallthrough
CT: control target
= control target key end

     0   :  { %s258_s0 = inlined_call_operand.vmem [shape: f32[1,128], index: 0, kind: input, shape index: {}]   ;;  %s259_s1 = inlined_call_operand.vmem [shape: f32[32,1], index: 1, kind: input, shape index: {}]   ;;  %s260_s2 = inlined_call_operand.vmem [shape: f32[32,1], index: 2, kind: input, shape index: {}]   ;;  %s261_s3 = inlined_call_operand.vmem [shape: f32[32,1], index: 3, kind: input, shape index: {}]   ;;  %s262_s4 = inlined_call_operand.<no memory space> [shape: f32[1,1], index: 4, kind: input, shape index: {}]   ;;  %s263_s5 = inlined_call_operand.hbm [shape: f32[1,128], index: 5, kind: output, shape index: {}]  }
   0x1   :  { %v10_v0 = vstv %s262_s4 }
   0x2   :  { %11 = vst [vmem:[#allocation2] sm:$0x1] %v10_v0 }
   0x3   :  { %v25_v1 = vld [vmem:[%s259_s1 + $0x10] sm:$0xff]  ;;  %v23_v2 = vld [vmem:[%s259_s1] sm:$0xff]  ;;  %v181_v3 = vmov 0   ;;  %v56_v4 = vld [vmem:[%s260_s2 + $0x8] sm:$0xff] }
   0x4   :  { %152 = vset.pattern.permute.xlu1 %v181_v3  ;;  %151 = vset.pattern.permute.xlu0 %v181_v3 }
   0x5   :  { %40 = vperm.xlu1 %152, %v25_v1   ;;  %30 = vperm.xlu0 %151, %v23_v2  }
   0x6   :  { %153 = vset.pattern.permute.xlu2 %v181_v3 }
   0x7   :  { %66 = vperm.xlu2 %153, %v56_v4  }
   0x8   :  { %12 = vsyncpa [#allocation4], 0  ;;  %v55_v5 = vld [vmem:[%s260_s2] sm:$0xff]  ;;  %v24_v6 = vld [vmem:[%s259_s1 + $0x8] sm:$0xff]  ;;  %s140_s20 = sshll.u32 %s263_s5, 4  ;;  %s141_s20 = int_to_ptr.hbm [resolvable:$true] %s140_s20 }
   0x9   :  { %v26_v7 = vld [vmem:[%s259_s1 + $0x18] sm:$0xff]  ;;  %v57_v9 = vld [vmem:[%s260_s2 + $0x10] sm:$0xff]  ;;  %v87_v10 = vld [vmem:[%s261_s3] sm:$0xff] }
   0xa   :  { %v58_v8 = vld [vmem:[%s260_s2 + $0x18] sm:$0xff]  ;;  %v89_v11 = vld [vmem:[%s261_s3 + $0x10] sm:$0xff]  ;;  %v88_v12 = vld [vmem:[%s261_s3 + $0x8] sm:$0xff] }
   0xb   :  { %v90_v13 = vld [vmem:[%s261_s3 + $0x18] sm:$0xff]  ;;  %v124_v14 = vld [vmem:[#allocation2] sm:$0x1] }
   0xc   :  { %v154_v21 = vld [vmem:[%s258_s0] ss:$0 sm:$0xff]  ;;  %s182_s0 = smov [#allocation3]  }
   0xd   :  { %61 = vperm.xlu1 %152, %v55_v5   ;;  %35 = vperm.xlu0 %151, %v24_v6   ;;  %s138_s3 = sshll.u32 %s182_s0, 4  ;;  %s139_s3 = int_to_ptr.vmem [resolvable:$true] %s138_s3 }
   0xf   :  { %45 = vperm.xlu2 %153, %v26_v7  }
  0x15   :  { %76 = vperm.xlu1 %152, %v58_v8   ;;  %71 = vperm.xlu0 %151, %v57_v9  }
  0x17   :  { %93 = vperm.xlu2 %153, %v87_v10  }
  0x1d   :  { %103 = vperm.xlu1 %152, %v89_v11   ;;  %98 = vperm.xlu0 %151, %v88_v12  }
  0x1f   :  { %108 = vperm.xlu2 %153, %v90_v13  }
  0x25   :  { %127 = vperm.xlu0 %151, %v124_v14  }
  0x61   :  { %v67_v15 = vpop.permute.xlu2 %66 }
  0x69   :  { %v46_v18 = vpop.permute.xlu2 %45 }
  0x6a   :  { %v54_v28 = vmul.f32 %v154_v21, %v46_v18 }
  0x71   :  { %v94_v27 = vpop.permute.xlu2 %93 }
  0x77   :  { %v41_v16 = vpop.permute.xlu1 %40  ;;  %v31_v17 = vpop.permute.xlu0 %30 }
  0x78   :  { %v51_v22 = vmul.f32 %v154_v21, %v31_v17  ;;  %v53_v29 = vmul.f32 %v154_v21, %v41_v16 }
  0x79   :  { %v109_v43 = vpop.permute.xlu2 %108 }
  0x7f   :  { %v62_v19 = vpop.permute.xlu1 %61  ;;  %v36_v20 = vpop.permute.xlu0 %35 }
  0x80   :  { %v52_v23 = vmul.f32 %v154_v21, %v36_v20  ;;  %v79_v26 = vadd.f32 %v62_v19, %v51_v22 }
  0x82   :  { %v80_v30 = vadd.f32 %v67_v15, %v52_v23  ;;  %v83_v31 = vmax.f32 %v79_v26, 0.0 }
  0x84   :  { %v84_v34 = vmax.f32 %v80_v30, 0.0  ;;  %v111_v37 = vmul.f32 %v94_v27, %v83_v31 }
  0x87   :  { %v77_v24 = vpop.permute.xlu1 %76  ;;  %v72_v25 = vpop.permute.xlu0 %71 }
  0x88   :  { %v82_v32 = vadd.f32 %v77_v24, %v54_v28  ;;  %v81_v33 = vadd.f32 %v72_v25, %v53_v29 }
  0x8a   :  { %v86_v38 = vmax.f32 %v82_v32, 0.0  ;;  %v85_v39 = vmax.f32 %v81_v33, 0.0 }
  0x8c   :  { %v114_v44 = vmul.f32 %v109_v43, %v86_v38 }
  0x8f   :  { %v104_v35 = vpop.permute.xlu1 %103  ;;  %v99_v36 = vpop.permute.xlu0 %98 }
  0x90   :  { %v112_v40 = vmul.f32 %v99_v36, %v84_v34  ;;  %v113_v41 = vmul.f32 %v104_v35, %v85_v39 }
  0x92   :  { %v115_v42 = vadd.f32 %v112_v40, %v111_v37 }
  0x94   :  { %v116_v45 = vadd.f32 %v115_v42, %v113_v41 }
  0x96   :  { %v117_v46 = vadd.f32 %v116_v45, %v114_v44 }
  0x97   :  { %v128_v51 = vpop.permute.xlu0 %127 }
  0x98   :  { %v118_v47 = vrot.slane %v117_v46, 4  ;;  %v130_v54 = vperm.slane %v128_v51, 0 }
  0x9a   :  { %v119_v48 = vadd.f32 %v118_v47, %v117_v46 }
  0x9c   :  { %v120_v49 = vrot.slane %v119_v48, 2 }
  0x9e   :  { %v121_v50 = vadd.f32 %v120_v49, %v119_v48 }
  0xa0   :  { %v122_v52 = vrot.slane %v121_v50, 1 }
  0xa2   :  { %v123_v53 = vadd.f32 %v122_v52, %v121_v50 }
  0xa4   :  { %v131_v55 = vadd.f32 %v130_v54, %v123_v53 }
  0xa6   :  { %132 = vst [vmem:[#allocation3] sm:$0x1] %v131_v55 }
  0xa7   :  { %143 = dma.vmem_to_hbm [thread:$0]  %s139_s3, 16, %s141_s20, [#allocation4]  }
  0xa8   :  { %179 = dma.done.wait [#allocation4], 16  }
  0xa9   :  { %180 = vsyncadd [#allocation4], 4294967280 }
  0xaa   :  { %148 = vsyncpa [#allocation4], 1 }

</bundles_post_ra>
